<compile_context>
chip_gen: v6e
topology: v6e:2x2x1
jax: 0.10.0
libtpu: 0.0.40
codegen_flags: <defaults>
</compile_context>

<pallas_src>
import math
import random

import jax
import jax.numpy as jnp
import numpy as np
from jax.experimental import pallas as pl
from jax.experimental.pallas import tpu as pltpu

LANE = 128


def _round_up(a, b):
    return ((a + b - 1) // b) * b


# ----------------------------- Pallas kernel ------------------------------ #
def edge_pool_kernel(s_ref, w_ref, b_ref, out_ref):
    # s_ref : [F, TM]    (lane-dense merge_edge_sum rows: edges then self-edges)
    # w_ref : [D+1, F]   (transform weights with score_net folded in)
    # b_ref : [D+1, 1]
    # out   : [D+1, TM]  rows 0..D-1 = transform(s), row D = sigmoid edge score
    y = jnp.dot(w_ref[...], s_ref[...],
                preferred_element_type=jnp.float32) + b_ref[...]
    d = w_ref.shape[0] - 1                                          # static
    row = jax.lax.broadcasted_iota(jnp.int32, y.shape, 0)
    # sigmoid only lands on the score row (EdgePooling.compute_edge_score_sigmoid)
    out_ref[...] = jnp.where(row == d, jax.nn.sigmoid(y), y)


def edge_pool_pallas(s_t, w_aug_t, b_aug_t, *, tm_max=8192, min_split_cols=4096):
    """Fused transform + score on lane-dense rows.

    s_t : [F, R] where each column is (x[src]+x[dst]) or 2*x (self rows).
    Returns [D+1, R]: rows 0..D-1 are transform(s), row D is the sigmoid score.
    """
    F, R = s_t.shape
    Dp1 = w_aug_t.shape[0]

    cols128 = _round_up(max(R, 1), LANE)
    n_blocks = pl.cdiv(cols128, tm_max)
    # v7x has two TensorCores; split into >=2 parallel blocks, but only when
    # rows are large enough to amortize the extra ~0.35 us grid-step overhead
    # (on single-TC v5e/v6e the split would be pure overhead).
    if n_blocks == 1 and cols128 >= min_split_cols:
        n_blocks = 2
    tm_eff = _round_up(pl.cdiv(cols128, n_blocks), LANE)
    cols_pad = n_blocks * tm_eff

    if cols_pad != R:   # single pad of the fused (edge + self) stream
        s_t = jnp.pad(s_t, ((0, 0), (0, cols_pad - R)))

    cost = pl.CostEstimate(
        flops=2 * Dp1 * F * cols_pad,
        transcendentals=Dp1 * cols_pad,
        bytes_accessed=(F * cols_pad + Dp1 * cols_pad + Dp1 * F + Dp1) * 4,
    )

    out = pl.pallas_call(
        edge_pool_kernel,
        out_shape=jax.ShapeDtypeStruct((Dp1, cols_pad), jnp.float32),
        grid_spec=pltpu.PrefetchScalarGridSpec(
            num_scalar_prefetch=0,
            grid=(n_blocks,),
            in_specs=[
                pl.BlockSpec((F, tm_eff), lambda i: (0, i)),
                pl.BlockSpec((Dp1, F), lambda i: (0, 0)),   # resident weights
                pl.BlockSpec((Dp1, 1), lambda i: (0, 0)),   # resident bias
            ],
            out_specs=pl.BlockSpec((Dp1, tm_eff), lambda i: (0, i)),
        ),
        compiler_params=pltpu.CompilerParams(
            dimension_semantics=("parallel",)),
        cost_estimate=cost,
    )(s_t, w_aug_t, b_aug_t)
    # Padded columns carry bias-only garbage; slice them off here (kernel
    # outputs must never be returned padded).
    return out[:, :R]


# ------------------------- host-side graph glue ---------------------------- #
def merge_edges_host(x, edge_index, batch, edge_score, x_merged,
                     x_merged_self, seed=0):
    """EdgePooling.__merge_edges__ — sequential greedy stochastic contraction
    (keep edge when rng.random() <= score, as in the reference `r > score:
    continue`). Runs on host (python `random`, set bookkeeping); not a TPU
    hot path."""
    rng = random.Random(seed)
    N = x.shape[0]
    nodes_remaining = set(range(N))
    cluster = np.zeros(N, dtype=np.int64)
    es = np.asarray(edge_score)
    ei = np.asarray(edge_index)
    xm = np.asarray(x_merged)
    xms = np.asarray(x_merged_self)
    order = np.argsort(-es)                    # descending
    i = 0
    emb_cat = []
    new_edge_indices = []
    for eidx in order.tolist():
        src = int(ei[0, eidx])
        r = rng.random()
        if r > es[eidx]:
            continue
        if src not in nodes_remaining:
            continue
        tgt = int(ei[1, eidx])
        if tgt not in nodes_remaining:
            continue
        emb_cat.append(xm[eidx])
        new_edge_indices.append(eidx)
        cluster[src] = i
        nodes_remaining.remove(src)
        if src != tgt:
            cluster[tgt] = i
            nodes_remaining.remove(tgt)
        i += 1
    for node_idx in sorted(nodes_remaining):
        cluster[node_idx] = i
        emb_cat.append(xms[node_idx])
        i += 1
    new_x = jnp.asarray(np.vstack(emb_cat), dtype=jnp.float32)
    # TODO(synk): coarsened edge_index / batch (coalesce, remove_self_loops,
    # scatter) omitted — MotiFiesta.forward breaks before re-using them.
    return new_x, cluster


# ------------------------------ MotiFiesta --------------------------------- #
class MotiFiestaPallas:
    def __init__(self, n_features=16, dim=32, seed=0):
        self.n_features = n_features
        self.dim = dim
        # Deterministic parameter init (PyTorch Linear-style uniform bounds).
        k = jax.random.PRNGKey(seed)
        k1, k2, k3, k4 = jax.random.split(k, 4)
        bt = 1.0 / math.sqrt(n_features)
        bs = 1.0 / math.sqrt(dim)
        # transform: Linear(n_features, dim) — stored as [F, D] (x @ W)
        self.w_t = jax.random.uniform(k1, (n_features, dim), jnp.float32, -bt, bt)
        self.b_t = jax.random.uniform(k2, (1, dim), jnp.float32, -bt, bt)
        # score_net: Linear(dim, 1) — stored as [D, 1]
        self.w_s = jax.random.uniform(k3, (dim, 1), jnp.float32, -bs, bs)
        self.b_s = jax.random.uniform(k4, (1, 1), jnp.float32, -bs, bs)
        # Fused weights (transposed, lane-dense kernel layout):
        #   W_aug^T @ s^T produces [transform(s) ; raw_score(s)]   (exact up
        #   to f32 reassociation for the score row).
        w_score = self.w_t @ self.w_s                       # [F, 1]
        b_score = self.b_t @ self.w_s + self.b_s            # [1, 1]
        self.w_aug_t = jnp.concatenate([self.w_t.T, w_score.T], axis=0)  # [D+1, F]
        self.b_aug_t = jnp.concatenate([self.b_t.T, b_score], axis=0)    # [D+1, 1]

    def pool_outputs(self, x, edge_index):
        """Runs the fused Pallas kernel for edge rows and self rows."""
        N, _ = x.shape
        E = edge_index.shape[1]
        D = self.dim
        src = edge_index[0]
        dst = edge_index[1]
        # Single pre-summed, lane-dense input stream:
        #   cols 0..E-1   : x[src]+x[dst]   (merge_edge_sum on real edges)
        #   cols E..E+N-1 : 2*x             (merge_edge_sum on self-edges)
        x_t = x.T                                                    # [F, N]
        s_t = jnp.concatenate([x_t[:, src] + x_t[:, dst], 2.0 * x_t], axis=1)
        out = edge_pool_pallas(s_t, self.w_aug_t, self.b_aug_t)      # [D+1, E+N]
        x_merged = out[:D, :E].T                                     # [E, D]
        e = out[D, :E]                                               # [E]
        x_merged_self = out[:D, E:E + N].T                           # [N, D]
        return x_merged, e, x_merged_self

    def forward(self, x, edge_index, batch):
        xx = [x]
        x_merged, e, x_merged_self = self.pool_outputs(x, edge_index)
        new_x, _cluster = merge_edges_host(x, edge_index, batch, e,
                                           x_merged, x_merged_self)
        xx.append(new_x)
        pp = jnp.expand_dims(e, 0)            # torch.vstack([e]) -> [1, E]
        del pp                                 # only printed in the reference
        # MotiFiesta.forward breaks after the first layer and returns xx
        return xx


# --------------------------------- main ------------------------------------ #
if __name__ == "__main__":
    N, F, D, E = 12, 16, 32, 20
    key = jax.random.PRNGKey(0)
    kx, ks, kd = jax.random.split(key, 3)
    x = jax.random.normal(kx, (N, F), dtype=jnp.float32)
    src = jax.random.randint(ks, (E,), 0, N, dtype=jnp.int32)
    dst = jax.random.randint(kd, (E,), 0, N, dtype=jnp.int32)
    edge_index = jnp.stack([src, dst], axis=0)          # [2, E]
    batch = jnp.zeros((N,), dtype=jnp.int32)

    model = MotiFiestaPallas(n_features=F, dim=D, seed=0)

    # Pure-JAX two-matmul reference (as in the PyTorch module) + tolerance
    # check of the kernel outputs (the score-row weight folding reassociates
    # f32 accumulation, so bit-exactness is not expected).
    x_merged, e, x_merged_self = model.pool_outputs(x, edge_index)
    s_rows = jnp.concatenate([x[src] + x[dst], 2.0 * x], axis=0)     # [E+N, F]
    hi = jax.lax.Precision.HIGHEST
    m_ref = jnp.dot(s_rows, model.w_t, precision=hi) + model.b_t
    score_ref = jax.nn.sigmoid(
        jnp.dot(m_ref, model.w_s, precision=hi) + model.b_s)[:, 0]
    np.testing.assert_allclose(np.asarray(x_merged), np.asarray(m_ref[:E]),
                               rtol=5e-3, atol=5e-3)
    np.testing.assert_allclose(np.asarray(x_merged_self), np.asarray(m_ref[E:]),
                               rtol=5e-3, atol=5e-3)
    np.testing.assert_allclose(np.asarray(e), np.asarray(score_ref[:E]),
                               rtol=5e-3, atol=5e-3)

    xx = model.forward(x, edge_index, batch)
    for t in xx:
        jax.block_until_ready(t)

    assert xx[0].shape == (N, F)
    assert xx[1].shape[1] == D
    print("KERNEL_OK")
</pallas_src>

<mosaic_0001>
module attributes {stable_mosaic.version = 11 : i64} {
  func.func @edge_pool_kernel(%arg0: i32, %arg1: memref<16x128xf32, #tpu.memory_space<vmem>>, %arg2: memref<33x16xf32, #tpu.memory_space<vmem>>, %arg3: memref<33x1xf32, #tpu.memory_space<vmem>>, %arg4: memref<33x128xf32, #tpu.memory_space<vmem>>) attributes {dimension_semantics = [#tpu.dimension_semantics<parallel>], iteration_bounds = array<i64: 1>, scalar_prefetch = 0 : i64, scratch_operands = 0 : i64, tpu.core_type = #tpu.core_type<tc>, window_params = [{transform_indices = @transform_0, window_bounds = array<i64: 16, 128>}, {pipeline_mode = #tpu.pipeline_mode<synchronous>, transform_indices = @transform_1, window_bounds = array<i64: 33, 16>}, {pipeline_mode = #tpu.pipeline_mode<synchronous>, transform_indices = @transform_2, window_bounds = array<i64: 33, 1>}, {transform_indices = @transform_3, window_bounds = array<i64: 33, 128>}]} {
    %c0 = arith.constant 0 : index
    %c0_0 = arith.constant 0 : index
    %0 = vector.load %arg2[%c0, %c0_0] : memref<33x16xf32, #tpu.memory_space<vmem>>, vector<33x16xf32>
    %c0_1 = arith.constant 0 : index
    %c0_2 = arith.constant 0 : index
    %1 = vector.load %arg1[%c0_1, %c0_2] : memref<16x128xf32, #tpu.memory_space<vmem>>, vector<16x128xf32>
    %cst = arith.constant dense<0.000000e+00> : vector<33x128xf32>
    %2 = tpu.matmul %0, %1, %cst {dimension_numbers = #tpu.dot_dimension_numbers<[1], [0], [0], [1], [0, 0, 1, 1], [], []>} : vector<33x16xf32>, vector<16x128xf32>, vector<33x128xf32> -> vector<33x128xf32>
    %c0_3 = arith.constant 0 : index
    %c0_4 = arith.constant 0 : index
    %3 = vector.load %arg3[%c0_3, %c0_4] : memref<33x1xf32, #tpu.memory_space<vmem>>, vector<33x1xf32>
    %4 = vector.broadcast %3 : vector<33x1xf32> to vector<33x128xf32>
    %5 = arith.addf %2, %4 : vector<33x128xf32>
    %6 = tpu.iota {dimensions = array<i32: 0>} : vector<33x128xi32>
    %c32_i32 = arith.constant 32 : i32
    %7 = vector.broadcast %c32_i32 : i32 to vector<33x128xi32>
    %8 = arith.cmpi eq, %6, %7 : vector<33x128xi32>
    %9 = arith.negf %5 : vector<33x128xf32>
    %10 = math.exp %9 : vector<33x128xf32>
    %cst_5 = arith.constant 1.000000e+00 : f32
    %11 = vector.broadcast %cst_5 : f32 to vector<33x128xf32>
    %12 = arith.addf %11, %10 : vector<33x128xf32>
    %13 = arith.divf %11, %12 : vector<33x128xf32>
    %14 = arith.select %8, %13, %5 : vector<33x128xi1>, vector<33x128xf32>
    %c0_6 = arith.constant 0 : index
    %c0_7 = arith.constant 0 : index
    %15 = vector.load %arg4[%c0_6, %c0_7] : memref<33x128xf32, #tpu.memory_space<vmem>>, vector<33x128xf32>
    tpu.vector_store %arg4[%c0_6, %c0_7], %14 {strides = array<i32>} : memref<33x128xf32, #tpu.memory_space<vmem>>, vector<33x128xf32>,
    return
  }
  func.func @transform_0(%arg0: i32) -> (i32, i32) {
    %c0_i32 = arith.constant 0 : i32
    %c0_i32_0 = arith.constant 0 : i32
    return %c0_i32, %arg0 : i32, i32
  }
  func.func @transform_1(%arg0: i32) -> (i32, i32) {
    %c0_i32 = arith.constant 0 : i32
    %c0_i32_0 = arith.constant 0 : i32
    %c0_i32_1 = arith.constant 0 : i32
    return %c0_i32, %c0_i32_0 : i32, i32
  }
  func.func @transform_2(%arg0: i32) -> (i32, i32) {
    %c0_i32 = arith.constant 0 : i32
    %c0_i32_0 = arith.constant 0 : i32
    %c0_i32_1 = arith.constant 0 : i32
    return %c0_i32, %c0_i32_0 : i32, i32
  }
  func.func @transform_3(%arg0: i32) -> (i32, i32) {
    %c0_i32 = arith.constant 0 : i32
    %c0_i32_0 = arith.constant 0 : i32
    return %c0_i32, %arg0 : i32, i32
  }
}

</mosaic_0001>

<bundles_post_ra>
// kernel: tpu_custom_call.1
= control target key start
LH: loop header
LB: loop body
LE: loop exit
PB: predicated region body
PF: predicated region fallthrough
CT: control target
= control target key end

     0   :  { %v299_v1 = vmov 0.0   ;;  %vm300_vm0 = vmmov 0   ;;  %vm52_vm1 = vcmask 130048   ;;  %s374_s0 = inlined_call_operand.vmem [shape: f32[16,128], index: 0, kind: input, shape index: {}]   ;;  %s375_s1 = inlined_call_operand.vmem [shape: f32[33,16], index: 1, kind: input, shape index: {}]   ;;  %s376_s2 = inlined_call_operand.vmem [shape: f32[33,1], index: 2, kind: input, shape index: {}]   ;;  %s377_s3 = inlined_call_operand.hbm [shape: f32[33,128], index: 3, kind: output, shape index: {}]  }
   0x1   :  { %v21_v0 = vld [vmem:[%s374_s0 + $0x8] sm:$0xff]  ;;  %261 = vmatprep.subr.mxu1 %v299_v1  ;;  %v20_v2 = vld [vmem:[%s374_s0] sm:$0xff]  ;;  %255 = vmatprep.mubr.msk.f32.mxu1 %vm300_vm0, %v299_v1  ;;  %v18_v3 = vld [vmem:[%s375_s1 + $0x18] sm:$0xff] }
   0x2   :  { %263 = vmatpush3.msra.mxu1 %v21_v0  ;;  %242 = vmatprep.subr.mxu0 %v299_v1  ;;  %v15_v4 = vld [vmem:[%s375_s1] sm:$0xff] }
   0x3   :  { %262 = vmatprep.subr.mxu1 %v299_v1  ;;  %243 = vmatpush3.msra.mxu0 %v21_v0 }
   0x4   :  { %264 = vmatpush3.msra.mxu1 %v20_v2  ;;  %244 = vmatprep.subr.mxu0 %v299_v1 }
   0x5   :  { %8 = vsyncpa [#allocation3], 0  ;;  %256 = vmatmul.mubr.msk.f32.vlgmr.msra.gmra.mxu1 %vm52_vm1, %v18_v3  ;;  %245 = vmatpush3.msra.mxu0 %v20_v2  ;;  %v26_v5 = vld [vmem:[%s376_s2 + $0x20] sm:$0x1]  ;;  %v301_v7 = vmov 0   ;;  %v23_v8 = vld [vmem:[%s376_s2 + $0x8] sm:$0xff]  ;;  %v158_v37 = vlaneseq }
   0x6   :  { %246 = vmatprep.mubr.msk.f32.mxu0 %vm300_vm0, %v299_v1  ;;  %258 = vmatprep.mubr.msk.f32.mxu1 %vm300_vm0, %v299_v1  ;;  %v19_v6 = vld [vmem:[%s375_s1 + $0x20] sm:$0x1]  ;;  %v16_v9 = vld [vmem:[%s375_s1 + $0x8] sm:$0xff]  ;;  %v24_v11 = vld [vmem:[%s376_s2 + $0x10] sm:$0xff] }
   0x7   :  { %247 = vmatmul.mubr.msk.f32.vlgmr.msra.gmra.mxu0 %vm52_vm1, %v15_v4  ;;  %271 = vset.pattern.permute.xlu0 %v301_v7  ;;  %v22_v10 = vld [vmem:[%s376_s2] sm:$0xff]  ;;  %v17_v12 = vld [vmem:[%s375_s1 + $0x10] sm:$0xff]  ;;  %v25_v13 = vld [vmem:[%s376_s2 + $0x18] sm:$0xff]  ;;  %v159_v38 = vshrl.u32 %v158_v37, 7  ;;  %s302_s1 = smov [#allocation2]  }
   0x8   :  { %249 = vmatprep.mubr.msk.f32.mxu0 %vm300_vm0, %v299_v1  ;;  %49 = vperm.xlu0 %271, %v26_v5   ;;  %s214_s2 = sshll.u32 %s302_s1, 4  ;;  %s215_s2 = int_to_ptr.vmem [resolvable:$true] %s214_s2 }
   0x9   :  { %259 = vmatmul.mubr.msk.f32.gmra.mxu1 %vm52_vm1, %v19_v6  ;;  %272 = vset.pattern.permute.xlu1 %v301_v7  ;;  %v163_v39 = vadd.s32 32, %v159_v38  ;;  %s277_s8 = scalar_lea.vmem %s215_s2, 640  ;;  %p282_p1 = scmp.lt.s32.totalorder %s215_s2, %s215_s2 }
   0xa   :  { %34 = vperm.xlu1 %272, %v23_v8   ;;  %p278_p0 = scmp.ne.s32.totalorder %s215_s2, %s277_s8  ;;  %p283_p2 = scmp.lt.s32.totalorder %s277_s8, %s277_s8 }
   0xb   :  { %250 = vmatmul.mubr.msk.f32.gmra.mxu0 %vm52_vm1, %v16_v9  ;;  %vm168_vm2 = vcmp.eq.s32.totalorder %v163_v39, 32 }
   0xc   :  { %252 = vmatprep.mubr.msk.f32.mxu0 %vm300_vm0, %v299_v1  ;;  %29 = vperm.xlu0 %271, %v22_v10   ;;  %p284_p3 = por %p283_p2, %p282_p1 }
   0xe   :  { %39 = vperm.xlu1 %272, %v24_v11   ;;  %p285_p4 = pnand %p284_p3, %p278_p0 }
   0xf   :  { %253 = vmatmul.mubr.msk.f32.gmra.mxu0 %vm52_vm1, %v17_v12 }
  0x10   :  { %44 = vperm.xlu0 %271, %v25_v13  }
  0x83   :  { %v50_v14 = vpop.permute.xlu0 %49 }
  0x85   :  { %v35_v19 = vpop.permute.xlu1 %34 }
  0x87   :  { %v30_v15 = vpop.permute.xlu0 %29 }
  0x89   :  { %v40_v31 = vpop.permute.xlu1 %39 }
  0x8b   :  { %v45_v16 = vpop.permute.xlu0 %44 }
  0xc5   :  { %v149_v17 = vpop.f32.mrf.mxu1 }
  0xc6   :  { %v150_v18 = vadd.f32 %v149_v17, %v45_v16 }
  0xc7   :  { %v257_v20 = vpop.f32.mrf.mxu1  ;;  %v134_v21 = vpop.f32.mrf.mxu0 }
  0xc8   :  { %207 = vst [vmem:[#allocation2 + $0x18] sm:$0xff] %v150_v18  ;;  %v135_v22 = vadd.f32 %v134_v21, %v30_v15 }
  0xc9   :  { %v154_v23 = vpop.f32.mrf.mxu1  ;;  %v248_v24 = vpop.f32.mrf.mxu0 }
  0xca   :  { %204 = vst [vmem:[#allocation2] sm:$0xff] %v135_v22  ;;  %v155_v25 = vadd.f32 %v154_v23, %v50_v14 }
  0xcb   :  { %v260_v26 = vpop.f32.mrf.mxu1  ;;  %v139_v27 = vpop.f32.mrf.mxu0 }
  0xcc   :  { %v234_v28 = vmul.f32 -1.442695, %v155_v25  ;;  %v140_v29 = vadd.f32 %v139_v27, %v35_v19 }
  0xcd   :  { %v251_v30 = vpop.f32.mrf.mxu0 }
  0xce   :  { %273 = vpow2.f32 %v234_v28  ;;  %205 = vst [vmem:[#allocation2 + $0x8] sm:$0xff] %v140_v29 }
  0xcf   :  { %v144_v32 = vpop.f32.mrf.mxu0 }
  0xd0   :  { %v145_v33 = vadd.f32 %v144_v32, %v40_v31 }
  0xd1   :  { %v254_v34 = vpop.f32.mrf.mxu0 }
  0xd2   :  { %206 = vst [vmem:[#allocation2 + $0x10] sm:$0xff] %v145_v33 }
  0xdb   :  { %v274_v35 = vpop.eup %273 }
  0xdc   :  { %v188_v36 = vadd.f32 1.0, %v274_v35 }
  0xde   :  { %275 = vrcp.f32 %v188_v36 }
  0xeb   :  { %v276_v40 = vpop.eup %275 }
  0xec   :  { %v203_v41 = vsel %vm168_vm2, %v276_v40, %v155_v25 }
  0xed   :  { %208 = vst [vmem:[#allocation2 + $0x20] sm:$0x1] %v203_v41 }
  0xee   :  { %288 = shalt.err (!%p285_p4)
}
  0xef   :  { %s303_s9 = smov 128   ;;  %s304_s10 = smov 8  }
  0xf0   :  { %220 = dma.vmem_to_hbm [thread:$0]  %s215_s2, 640, %s377_s3, [#allocation3], %s303_s9, %s303_s9, %s304_s10  }
  0xf1   :  { %297 = dma.done.wait [#allocation3], 640  }
  0xf2   :  { %298 = vsyncadd [#allocation3], 4294966656 }
  0xf3   :  { %224 = vsyncpa [#allocation3], 1 }

</bundles_post_ra>
